<compile_context>
chip_gen: v6e
topology: v6e:2x2x1
jax: 0.10.0
libtpu: 0.0.40
codegen_flags: <defaults>
</compile_context>

<pallas_src>
import functools

import jax
import jax.numpy as jnp
from jax.experimental import pallas as pl
from jax.experimental.pallas import tpu as pltpu

EPS = 1e-5
_BLOCK_BUDGET = 12 * 1024 * 1024   # per pipelined x block (lane-padded bytes)
_VMEM_LIMIT = 48 * 1024 * 1024     # < v7x 64 MiB physical; >> v5e 16 MiB default


def sa_kernel(x_ref, w_ref, bn_ref, o_ref, mx_sc, av_sc, *, inv_h, use_mxu):
    # x_ref: (NB, C, TH, W)   o_ref: (NB, C, W)   scratch: (NB, C, W) f32
    h_id = pl.program_id(1)
    nb, c, w_len = mx_sc.shape

    @pl.when(h_id == 0)
    def _init():
        mx_sc[...] = jnp.full_like(mx_sc, -jnp.inf)
        av_sc[...] = jnp.zeros_like(av_sc)

    # Running max / running sum over the H axis (static unroll over samples).
    for n in range(nb):
        xs = x_ref[n].astype(jnp.float32)                 # (C, TH, W)
        mx_sc[n] = jnp.maximum(mx_sc[n], jnp.max(xs, axis=1))
        av_sc[n] = av_sc[n] + jnp.sum(xs, axis=1)

    @pl.when(h_id == pl.num_programs(1) - 1)
    def _finish():
        w = w_ref[...].astype(jnp.float32)                # (C, C) shared 1x1 conv
        bn = bn_ref[...]                                  # (C, 4) folded BN params
        s1, t1 = bn[:, 0:1], bn[:, 1:2]                   # bn_sh1 scale / bias
        s2, t2 = bn[:, 2:3], bn[:, 3:4]                   # bn_sh2 scale / bias

        for n in range(nb):                               # static unroll, nb <= 8
            mx = mx_sc[n]                                 # (C, W) max over H
            av = av_sc[n] * inv_h                         # (C, W) mean over H

            if use_mxu:
                # One fused MXU matmul for both pooled paths (2W columns).
                pooled = jnp.concatenate([mx, av], axis=1)            # (C, 2W)
                conv = jnp.dot(w, pooled, preferred_element_type=jnp.float32)
                mxc, avc = conv[:, :w_len], conv[:, w_len:]
            else:
                # Small C: unrolled VPU broadcast-FMAs, skip the MXU entirely.
                mxc = jnp.zeros((c, w_len), jnp.float32)
                avc = jnp.zeros((c, w_len), jnp.float32)
                for i in range(c):
                    wc = w[:, i:i + 1]                    # (C, 1) weight column
                    mxc = mxc + wc * mx[i:i + 1, :]
                    avc = avc + wc * av[i:i + 1, :]

            mxc = mxc * s1 + t1                           # bn_sh1
            avc = avc * s2 + t2                           # bn_sh2

            # Softmax over the channel axis (axis 0 of (C, W)).
            logits = mxc * avc
            logits = logits - jnp.max(logits, axis=0, keepdims=True)
            e = jnp.exp(logits)
            att = e * pl.reciprocal(jnp.sum(e, axis=0, keepdims=True), approx=True)

            fusion = att[0:1, :] * avc + att[1:2, :] * mxc            # (C, W)
            o_ref[n] = fusion.astype(o_ref.dtype)


def _fold_bn(gamma, beta, rmean, rvar):
    s = gamma / jnp.sqrt(rvar + EPS)
    t = beta - rmean * s
    return s, t


def _pick_tiles(n, c, h, w, itemsize, budget):
    """Choose (samples per step, H-tile) against a padded-VMEM budget."""
    w_pad = pl.cdiv(w, 128) * 128                          # lane padding

    def block_bytes(nb, th):
        return nb * c * (pl.cdiv(th, 8) * 8) * w_pad * itemsize

    # Sample batching: largest divisor of N that is <= 8, but keep >= 2 grid
    # steps along the batch axis when possible (megacore / v7x).
    nb = 1
    for d in range(min(n, 8), 0, -1):
        if n % d == 0 and (n // d >= 2 or n == 1):
            nb = d
            break

    # H tiling: whole H when it fits (always BlockSpec-legal), otherwise the
    # largest multiple-of-8 divisor of H that fits; shrink nb if necessary.
    th_candidates = [h] + [t for t in range(8 * (h // 8), 0, -8)
                           if t < h and h % t == 0]
    while True:
        for th in th_candidates:
            if block_bytes(nb, th) <= budget:
                return nb, th
        if nb == 1:
            # H has no usable multiple-of-8 divisor: fall back to one full-H
            # block (may be VMEM-heavy for extreme shapes).
            return 1, th_candidates[-1]
        nb = max(d for d in range(1, nb) if n % d == 0)


def spatial_attention(x_nchw, conv_w, bn1, bn2):
    """x_nchw: (N, C, H, W); conv_w: (C, C, 1, 1); bn*: (gamma, beta, rmean, rvar)."""
    N, C, H, W = x_nchw.shape
    wmat = conv_w.reshape(C, C).astype(jnp.float32)        # (Cout, Cin)
    s1, t1 = _fold_bn(*bn1)
    s2, t2 = _fold_bn(*bn2)
    bn_packed = jnp.stack([s1, t1, s2, t2], axis=1).astype(jnp.float32)   # (C, 4)

    itemsize = jnp.dtype(x_nchw.dtype).itemsize
    nb, th = _pick_tiles(N, C, H, W, itemsize, _BLOCK_BUDGET)
    grid = (N // nb, H // th)

    kernel = functools.partial(sa_kernel, inv_h=1.0 / H, use_mxu=(C > 32))

    out = pl.pallas_call(
        kernel,
        out_shape=jax.ShapeDtypeStruct((N, C, W), x_nchw.dtype),
        grid_spec=pltpu.PrefetchScalarGridSpec(
            num_scalar_prefetch=0,
            grid=grid,
            in_specs=[
                pl.BlockSpec((nb, C, th, W), lambda n, h: (n, 0, h, 0)),  # x
                pl.BlockSpec((C, C), lambda n, h: (0, 0)),                # conv_sh
                pl.BlockSpec((C, 4), lambda n, h: (0, 0)),                # packed BN
            ],
            out_specs=pl.BlockSpec((nb, C, W), lambda n, h: (n, 0, 0)),
            scratch_shapes=[pltpu.VMEM((nb, C, W), jnp.float32),   # running max
                            pltpu.VMEM((nb, C, W), jnp.float32)],  # running sum
        ),
        compiler_params=pltpu.CompilerParams(
            dimension_semantics=("parallel", "arbitrary"),
            vmem_limit_bytes=_VMEM_LIMIT),
    )(x_nchw, wmat, bn_packed)

    return out.reshape(N, C, 1, W)                        # PyTorch output layout


def reference(x, conv_w, bn1, bn2):
    N, C, H, W = x.shape
    wmat = conv_w.reshape(C, C)
    mx = jnp.max(x, axis=2)                               # (N, C, W)
    av = jnp.mean(x, axis=2)
    mxc = jnp.einsum('oi,niw->now', wmat, mx, precision=jax.lax.Precision.HIGHEST)
    avc = jnp.einsum('oi,niw->now', wmat, av, precision=jax.lax.Precision.HIGHEST)
    g1, b1, rm1, rv1 = bn1
    g2, b2, rm2, rv2 = bn2

    def bn(v, g, b, rm, rv):
        g, b, rm, rv = (a[None, :, None] for a in (g, b, rm, rv))
        return (v - rm) / jnp.sqrt(rv + EPS) * g + b

    mxc = bn(mxc, g1, b1, rm1, rv1)
    avc = bn(avc, g2, b2, rm2, rv2)
    att = jax.nn.softmax(mxc * avc, axis=1)
    fusion = att[:, 0:1, :] * avc + att[:, 1:2, :] * mxc
    return fusion.reshape(N, C, 1, W)


if __name__ == "__main__":
    key = jax.random.PRNGKey(0)
    kx, kw, k1, k2 = jax.random.split(key, 4)

    # PyTorch-style input (N, C, H, W); N=4 exercises the sample-batched path.
    N, C, H, W = 4, 4, 16, 16
    x = jax.random.normal(kx, (N, C, H, W), jnp.float32)
    conv_w = jax.random.normal(kw, (C, C, 1, 1), jnp.float32) * (1.0 / jnp.sqrt(C))

    def bn_params(k):
        ka, kb, kc, kd = jax.random.split(k, 4)
        gamma = 1.0 + 0.1 * jax.random.normal(ka, (C,), jnp.float32)
        beta = 0.1 * jax.random.normal(kb, (C,), jnp.float32)
        rmean = 0.1 * jax.random.normal(kc, (C,), jnp.float32)
        rvar = 0.8 + 0.4 * jax.random.uniform(kd, (C,), jnp.float32)
        return gamma, beta, rmean, rvar

    bn1 = bn_params(k1)
    bn2 = bn_params(k2)

    out = jax.block_until_ready(spatial_attention(x, conv_w, bn1, bn2))
    ref = jax.block_until_ready(reference(x, conv_w, bn1, bn2))

    rel_err = float(jnp.max(jnp.abs(out - ref)) / (jnp.max(jnp.abs(ref)) + 1e-6))
    assert rel_err < 2e-2, f"mismatch vs reference, rel_err={rel_err}"
    print("KERNEL_OK")
</pallas_src>

<mosaic_0001>
module attributes {stable_mosaic.version = 11 : i64} {
  func.func @sa_kernel(%arg0: i32, %arg1: i32, %arg2: memref<2x4x16x16xf32, #tpu.memory_space<vmem>>, %arg3: memref<4x4xf32, #tpu.memory_space<vmem>>, %arg4: memref<4x4xf32, #tpu.memory_space<vmem>>, %arg5: memref<2x4x16xf32, #tpu.memory_space<vmem>>, %arg6: memref<2x4x16xf32, #tpu.memory_space<vmem>>, %arg7: memref<2x4x16xf32, #tpu.memory_space<vmem>>) attributes {dimension_semantics = [#tpu.dimension_semantics<parallel>, #tpu.dimension_semantics<arbitrary>], iteration_bounds = array<i64: 2, 1>, scalar_prefetch = 0 : i64, scratch_operands = 2 : i64, tpu.core_type = #tpu.core_type<tc>, window_params = [{transform_indices = @transform_0, window_bounds = array<i64: 2, 4, 16, 16>}, {pipeline_mode = #tpu.pipeline_mode<synchronous>, transform_indices = @transform_1, window_bounds = array<i64: 4, 4>}, {pipeline_mode = #tpu.pipeline_mode<synchronous>, transform_indices = @transform_2, window_bounds = array<i64: 4, 4>}, {transform_indices = @transform_3, window_bounds = array<i64: 2, 4, 16>}]} {
    %c0_i32 = arith.constant 0 : i32
    %0 = arith.cmpi eq, %arg1, %c0_i32 : i32
    %1 = arith.extui %0 : i1 to i32
    %c0_i32_0 = arith.constant 0 : i32
    %2 = arith.cmpi ne, %1, %c0_i32_0 : i32
    scf.if %2 {
      %cst_36 = arith.constant 0xFF800000 : f32
      %38 = vector.broadcast %cst_36 : f32 to vector<2x4x16xf32>
      %c0_37 = arith.constant 0 : index
      %c0_38 = arith.constant 0 : index
      %c0_39 = arith.constant 0 : index
      %39 = vector.load %arg6[%c0_37, %c0_38, %c0_39] : memref<2x4x16xf32, #tpu.memory_space<vmem>>, vector<2x4x16xf32>
      tpu.vector_store %arg6[%c0_37, %c0_38, %c0_39], %38 {strides = array<i32>} : memref<2x4x16xf32, #tpu.memory_space<vmem>>, vector<2x4x16xf32>,
      %cst_40 = arith.constant 0.000000e+00 : f32
      %40 = vector.broadcast %cst_40 : f32 to vector<2x4x16xf32>
      %c0_41 = arith.constant 0 : index
      %c0_42 = arith.constant 0 : index
      %c0_43 = arith.constant 0 : index
      %41 = vector.load %arg7[%c0_41, %c0_42, %c0_43] : memref<2x4x16xf32, #tpu.memory_space<vmem>>, vector<2x4x16xf32>
      tpu.vector_store %arg7[%c0_41, %c0_42, %c0_43], %40 {strides = array<i32>} : memref<2x4x16xf32, #tpu.memory_space<vmem>>, vector<2x4x16xf32>,
    } else {
    }
    %c0 = arith.constant 0 : index
    %c0_1 = arith.constant 0 : index
    %c0_2 = arith.constant 0 : index
    %c0_3 = arith.constant 0 : index
    %3 = vector.load %arg2[%c0, %c0_1, %c0_2, %c0_3] : memref<2x4x16x16xf32, #tpu.memory_space<vmem>>, vector<1x4x16x16xf32>
    %4 = vector.shape_cast %3 : vector<1x4x16x16xf32> to vector<4x16x16xf32>
    %c0_4 = arith.constant 0 : index
    %c0_5 = arith.constant 0 : index
    %c0_6 = arith.constant 0 : index
    %5 = vector.load %arg6[%c0_4, %c0_5, %c0_6] : memref<2x4x16xf32, #tpu.memory_space<vmem>>, vector<1x4x16xf32>
    %6 = vector.shape_cast %5 : vector<1x4x16xf32> to vector<4x16xf32>
    %cst = arith.constant dense<0xFF800000> : vector<4x16xf32>
    %7 = vector.multi_reduction <maximumf>, %4, %cst [1] : vector<4x16x16xf32> to vector<4x16xf32>
    %8 = arith.maximumf %6, %7 : vector<4x16xf32>
    %c0_7 = arith.constant 0 : index
    %c0_8 = arith.constant 0 : index
    %c0_9 = arith.constant 0 : index
    %9 = vector.load %arg6[%c0_7, %c0_8, %c0_9] : memref<2x4x16xf32, #tpu.memory_space<vmem>>, vector<1x4x16xf32>
    %10 = vector.shape_cast %9 : vector<1x4x16xf32> to vector<4x16xf32>
    %11 = vector.shape_cast %8 : vector<4x16xf32> to vector<1x4x16xf32>
    tpu.vector_store %arg6[%c0_7, %c0_8, %c0_9], %11 {strides = array<i32>} : memref<2x4x16xf32, #tpu.memory_space<vmem>>, vector<1x4x16xf32>,
    %c0_10 = arith.constant 0 : index
    %c0_11 = arith.constant 0 : index
    %c0_12 = arith.constant 0 : index
    %12 = vector.load %arg7[%c0_10, %c0_11, %c0_12] : memref<2x4x16xf32, #tpu.memory_space<vmem>>, vector<1x4x16xf32>
    %13 = vector.shape_cast %12 : vector<1x4x16xf32> to vector<4x16xf32>
    %cst_13 = arith.constant dense<0.000000e+00> : vector<4x16xf32>
    %14 = vector.multi_reduction <add>, %4, %cst_13 [1] : vector<4x16x16xf32> to vector<4x16xf32>
    %15 = arith.addf %13, %14 : vector<4x16xf32>
    %c0_14 = arith.constant 0 : index
    %c0_15 = arith.constant 0 : index
    %c0_16 = arith.constant 0 : index
    %16 = vector.load %arg7[%c0_14, %c0_15, %c0_16] : memref<2x4x16xf32, #tpu.memory_space<vmem>>, vector<1x4x16xf32>
    %17 = vector.shape_cast %16 : vector<1x4x16xf32> to vector<4x16xf32>
    %18 = vector.shape_cast %15 : vector<4x16xf32> to vector<1x4x16xf32>
    tpu.vector_store %arg7[%c0_14, %c0_15, %c0_16], %18 {strides = array<i32>} : memref<2x4x16xf32, #tpu.memory_space<vmem>>, vector<1x4x16xf32>,
    %c1 = arith.constant 1 : index
    %c0_17 = arith.constant 0 : index
    %c0_18 = arith.constant 0 : index
    %c0_19 = arith.constant 0 : index
    %19 = vector.load %arg2[%c1, %c0_17, %c0_18, %c0_19] : memref<2x4x16x16xf32, #tpu.memory_space<vmem>>, vector<1x4x16x16xf32>
    %20 = vector.shape_cast %19 : vector<1x4x16x16xf32> to vector<4x16x16xf32>
    %c1_20 = arith.constant 1 : index
    %c0_21 = arith.constant 0 : index
    %c0_22 = arith.constant 0 : index
    %21 = vector.load %arg6[%c1_20, %c0_21, %c0_22] : memref<2x4x16xf32, #tpu.memory_space<vmem>>, vector<1x4x16xf32>
    %22 = vector.shape_cast %21 : vector<1x4x16xf32> to vector<4x16xf32>
    %cst_23 = arith.constant dense<0xFF800000> : vector<4x16xf32>
    %23 = vector.multi_reduction <maximumf>, %20, %cst_23 [1] : vector<4x16x16xf32> to vector<4x16xf32>
    %24 = arith.maximumf %22, %23 : vector<4x16xf32>
    %c1_24 = arith.constant 1 : index
    %c0_25 = arith.constant 0 : index
    %c0_26 = arith.constant 0 : index
    %25 = vector.load %arg6[%c1_24, %c0_25, %c0_26] : memref<2x4x16xf32, #tpu.memory_space<vmem>>, vector<1x4x16xf32>
    %26 = vector.shape_cast %25 : vector<1x4x16xf32> to vector<4x16xf32>
    %27 = vector.shape_cast %24 : vector<4x16xf32> to vector<1x4x16xf32>
    tpu.vector_store %arg6[%c1_24, %c0_25, %c0_26], %27 {strides = array<i32>} : memref<2x4x16xf32, #tpu.memory_space<vmem>>, vector<1x4x16xf32>,
    %c1_27 = arith.constant 1 : index
    %c0_28 = arith.constant 0 : index
    %c0_29 = arith.constant 0 : index
    %28 = vector.load %arg7[%c1_27, %c0_28, %c0_29] : memref<2x4x16xf32, #tpu.memory_space<vmem>>, vector<1x4x16xf32>
    %29 = vector.shape_cast %28 : vector<1x4x16xf32> to vector<4x16xf32>
    %cst_30 = arith.constant dense<0.000000e+00> : vector<4x16xf32>
    %30 = vector.multi_reduction <add>, %20, %cst_30 [1] : vector<4x16x16xf32> to vector<4x16xf32>
    %31 = arith.addf %29, %30 : vector<4x16xf32>
    %c1_31 = arith.constant 1 : index
    %c0_32 = arith.constant 0 : index
    %c0_33 = arith.constant 0 : index
    %32 = vector.load %arg7[%c1_31, %c0_32, %c0_33] : memref<2x4x16xf32, #tpu.memory_space<vmem>>, vector<1x4x16xf32>
    %33 = vector.shape_cast %32 : vector<1x4x16xf32> to vector<4x16xf32>
    %34 = vector.shape_cast %31 : vector<4x16xf32> to vector<1x4x16xf32>
    tpu.vector_store %arg7[%c1_31, %c0_32, %c0_33], %34 {strides = array<i32>} : memref<2x4x16xf32, #tpu.memory_space<vmem>>, vector<1x4x16xf32>,
    %c0_i32_34 = arith.constant 0 : i32
    %35 = arith.cmpi eq, %arg1, %c0_i32_34 : i32
    %36 = arith.extui %35 : i1 to i32
    %c0_i32_35 = arith.constant 0 : i32
    %37 = arith.cmpi ne, %36, %c0_i32_35 : i32
    scf.if %37 {
      %c0_36 = arith.constant 0 : index
      %c0_37 = arith.constant 0 : index
      %38 = vector.load %arg3[%c0_36, %c0_37] : memref<4x4xf32, #tpu.memory_space<vmem>>, vector<4x4xf32>
      %c0_38 = arith.constant 0 : index
      %c0_39 = arith.constant 0 : index
      %39 = vector.load %arg4[%c0_38, %c0_39] : memref<4x4xf32, #tpu.memory_space<vmem>>, vector<4x4xf32>
      %40 = vector.extract_strided_slice %39 {offsets = [0, 0], sizes = [4, 1], strides = [1, 1]} : vector<4x4xf32> to vector<4x1xf32>
      %41 = vector.extract_strided_slice %39 {offsets = [0, 1], sizes = [4, 1], strides = [1, 1]} : vector<4x4xf32> to vector<4x1xf32>
      %42 = vector.extract_strided_slice %39 {offsets = [0, 2], sizes = [4, 1], strides = [1, 1]} : vector<4x4xf32> to vector<4x1xf32>
      %43 = vector.extract_strided_slice %39 {offsets = [0, 3], sizes = [4, 1], strides = [1, 1]} : vector<4x4xf32> to vector<4x1xf32>
      %c0_40 = arith.constant 0 : index
      %c0_41 = arith.constant 0 : index
      %c0_42 = arith.constant 0 : index
      %44 = vector.load %arg6[%c0_40, %c0_41, %c0_42] : memref<2x4x16xf32, #tpu.memory_space<vmem>>, vector<1x4x16xf32>
      %45 = vector.shape_cast %44 : vector<1x4x16xf32> to vector<4x16xf32>
      %c0_43 = arith.constant 0 : index
      %c0_44 = arith.constant 0 : index
      %c0_45 = arith.constant 0 : index
      %46 = vector.load %arg7[%c0_43, %c0_44, %c0_45] : memref<2x4x16xf32, #tpu.memory_space<vmem>>, vector<1x4x16xf32>
      %47 = vector.shape_cast %46 : vector<1x4x16xf32> to vector<4x16xf32>
      %cst_46 = arith.constant 6.250000e-02 : f32
      %48 = vector.broadcast %cst_46 : f32 to vector<4x16xf32>
      %49 = arith.mulf %47, %48 : vector<4x16xf32>
      %cst_47 = arith.constant 0.000000e+00 : f32
      %50 = vector.broadcast %cst_47 : f32 to vector<4x16xf32>
      %cst_48 = arith.constant 0.000000e+00 : f32
      %51 = vector.broadcast %cst_48 : f32 to vector<4x16xf32>
      %52 = vector.extract_strided_slice %38 {offsets = [0, 0], sizes = [4, 1], strides = [1, 1]} : vector<4x4xf32> to vector<4x1xf32>
      %53 = vector.extract_strided_slice %45 {offsets = [0, 0], sizes = [1, 16], strides = [1, 1]} : vector<4x16xf32> to vector<1x16xf32>
      %54 = vector.broadcast %52 : vector<4x1xf32> to vector<4x16xf32>
      %55 = vector.broadcast %53 : vector<1x16xf32> to vector<4x16xf32>
      %56 = arith.mulf %54, %55 : vector<4x16xf32>
      %57 = arith.addf %50, %56 : vector<4x16xf32>
      %58 = vector.extract_strided_slice %49 {offsets = [0, 0], sizes = [1, 16], strides = [1, 1]} : vector<4x16xf32> to vector<1x16xf32>
      %59 = vector.broadcast %52 : vector<4x1xf32> to vector<4x16xf32>
      %60 = vector.broadcast %58 : vector<1x16xf32> to vector<4x16xf32>
      %61 = arith.mulf %59, %60 : vector<4x16xf32>
      %62 = arith.addf %51, %61 : vector<4x16xf32>
      %63 = vector.extract_strided_slice %38 {offsets = [0, 1], sizes = [4, 1], strides = [1, 1]} : vector<4x4xf32> to vector<4x1xf32>
      %64 = vector.extract_strided_slice %45 {offsets = [1, 0], sizes = [1, 16], strides = [1, 1]} : vector<4x16xf32> to vector<1x16xf32>
      %65 = vector.broadcast %63 : vector<4x1xf32> to vector<4x16xf32>
      %66 = vector.broadcast %64 : vector<1x16xf32> to vector<4x16xf32>
      %67 = arith.mulf %65, %66 : vector<4x16xf32>
      %68 = arith.addf %57, %67 : vector<4x16xf32>
      %69 = vector.extract_strided_slice %49 {offsets = [1, 0], sizes = [1, 16], strides = [1, 1]} : vector<4x16xf32> to vector<1x16xf32>
      %70 = vector.broadcast %63 : vector<4x1xf32> to vector<4x16xf32>
      %71 = vector.broadcast %69 : vector<1x16xf32> to vector<4x16xf32>
      %72 = arith.mulf %70, %71 : vector<4x16xf32>
      %73 = arith.addf %62, %72 : vector<4x16xf32>
      %74 = vector.extract_strided_slice %38 {offsets = [0, 2], sizes = [4, 1], strides = [1, 1]} : vector<4x4xf32> to vector<4x1xf32>
      %75 = vector.extract_strided_slice %45 {offsets = [2, 0], sizes = [1, 16], strides = [1, 1]} : vector<4x16xf32> to vector<1x16xf32>
      %76 = vector.broadcast %74 : vector<4x1xf32> to vector<4x16xf32>
      %77 = vector.broadcast %75 : vector<1x16xf32> to vector<4x16xf32>
      %78 = arith.mulf %76, %77 : vector<4x16xf32>
      %79 = arith.addf %68, %78 : vector<4x16xf32>
      %80 = vector.extract_strided_slice %49 {offsets = [2, 0], sizes = [1, 16], strides = [1, 1]} : vector<4x16xf32> to vector<1x16xf32>
      %81 = vector.broadcast %74 : vector<4x1xf32> to vector<4x16xf32>
      %82 = vector.broadcast %80 : vector<1x16xf32> to vector<4x16xf32>
      %83 = arith.mulf %81, %82 : vector<4x16xf32>
      %84 = arith.addf %73, %83 : vector<4x16xf32>
      %85 = vector.extract_strided_slice %38 {offsets = [0, 3], sizes = [4, 1], strides = [1, 1]} : vector<4x4xf32> to vector<4x1xf32>
      %86 = vector.extract_strided_slice %45 {offsets = [3, 0], sizes = [1, 16], strides = [1, 1]} : vector<4x16xf32> to vector<1x16xf32>
      %87 = vector.broadcast %85 : vector<4x1xf32> to vector<4x16xf32>
      %88 = vector.broadcast %86 : vector<1x16xf32> to vector<4x16xf32>
      %89 = arith.mulf %87, %88 : vector<4x16xf32>
      %90 = arith.addf %79, %89 : vector<4x16xf32>
      %91 = vector.extract_strided_slice %49 {offsets = [3, 0], sizes = [1, 16], strides = [1, 1]} : vector<4x16xf32> to vector<1x16xf32>
      %92 = vector.broadcast %85 : vector<4x1xf32> to vector<4x16xf32>
      %93 = vector.broadcast %91 : vector<1x16xf32> to vector<4x16xf32>
      %94 = arith.mulf %92, %93 : vector<4x16xf32>
      %95 = arith.addf %84, %94 : vector<4x16xf32>
      %96 = vector.broadcast %40 : vector<4x1xf32> to vector<4x16xf32>
      %97 = arith.mulf %90, %96 : vector<4x16xf32>
      %98 = vector.broadcast %41 : vector<4x1xf32> to vector<4x16xf32>
      %99 = arith.addf %97, %98 : vector<4x16xf32>
      %100 = vector.broadcast %42 : vector<4x1xf32> to vector<4x16xf32>
      %101 = arith.mulf %95, %100 : vector<4x16xf32>
      %102 = vector.broadcast %43 : vector<4x1xf32> to vector<4x16xf32>
      %103 = arith.addf %101, %102 : vector<4x16xf32>
      %104 = arith.mulf %99, %103 : vector<4x16xf32>
      %cst_49 = arith.constant dense<0xFF800000> : vector<16xf32>
      %105 = vector.multi_reduction <maximumf>, %104, %cst_49 [0] : vector<4x16xf32> to vector<16xf32>
      %106 = vector.shape_cast %105 : vector<16xf32> to vector<1x16xf32>
      %107 = vector.broadcast %106 : vector<1x16xf32> to vector<4x16xf32>
      %108 = arith.subf %104, %107 : vector<4x16xf32>
      %109 = math.exp %108 : vector<4x16xf32>
      %cst_50 = arith.constant dense<0.000000e+00> : vector<16xf32>
      %110 = vector.multi_reduction <add>, %109, %cst_50 [0] : vector<4x16xf32> to vector<16xf32>
      %111 = vector.shape_cast %110 : vector<16xf32> to vector<1x16xf32>
      %112 = tpu.reciprocal %111 {approx = true} : vector<1x16xf32> -> vector<1x16xf32>
      %113 = vector.broadcast %112 : vector<1x16xf32> to vector<4x16xf32>
      %114 = arith.mulf %109, %113 : vector<4x16xf32>
      %115 = vector.extract_strided_slice %114 {offsets = [0, 0], sizes = [1, 16], strides = [1, 1]} : vector<4x16xf32> to vector<1x16xf32>
      %116 = vector.broadcast %115 : vector<1x16xf32> to vector<4x16xf32>
      %117 = arith.mulf %116, %103 : vector<4x16xf32>
      %118 = vector.extract_strided_slice %114 {offsets = [1, 0], sizes = [1, 16], strides = [1, 1]} : vector<4x16xf32> to vector<1x16xf32>
      %119 = vector.broadcast %118 : vector<1x16xf32> to vector<4x16xf32>
      %120 = arith.mulf %119, %99 : vector<4x16xf32>
      %121 = arith.addf %117, %120 : vector<4x16xf32>
      %c0_51 = arith.constant 0 : index
      %c0_52 = arith.constant 0 : index
      %c0_53 = arith.constant 0 : index
      %122 = vector.load %arg5[%c0_51, %c0_52, %c0_53] : memref<2x4x16xf32, #tpu.memory_space<vmem>>, vector<1x4x16xf32>
      %123 = vector.shape_cast %122 : vector<1x4x16xf32> to vector<4x16xf32>
      %124 = vector.shape_cast %121 : vector<4x16xf32> to vector<1x4x16xf32>
      tpu.vector_store %arg5[%c0_51, %c0_52, %c0_53], %124 {strides = array<i32>} : memref<2x4x16xf32, #tpu.memory_space<vmem>>, vector<1x4x16xf32>,
      %c1_54 = arith.constant 1 : index
      %c0_55 = arith.constant 0 : index
      %c0_56 = arith.constant 0 : index
      %125 = vector.load %arg6[%c1_54, %c0_55, %c0_56] : memref<2x4x16xf32, #tpu.memory_space<vmem>>, vector<1x4x16xf32>
      %126 = vector.shape_cast %125 : vector<1x4x16xf32> to vector<4x16xf32>
      %c1_57 = arith.constant 1 : index
      %c0_58 = arith.constant 0 : index
      %c0_59 = arith.constant 0 : index
      %127 = vector.load %arg7[%c1_57, %c0_58, %c0_59] : memref<2x4x16xf32, #tpu.memory_space<vmem>>, vector<1x4x16xf32>
      %128 = vector.shape_cast %127 : vector<1x4x16xf32> to vector<4x16xf32>
      %cst_60 = arith.constant 6.250000e-02 : f32
      %129 = vector.broadcast %cst_60 : f32 to vector<4x16xf32>
      %130 = arith.mulf %128, %129 : vector<4x16xf32>
      %cst_61 = arith.constant 0.000000e+00 : f32
      %131 = vector.broadcast %cst_61 : f32 to vector<4x16xf32>
      %cst_62 = arith.constant 0.000000e+00 : f32
      %132 = vector.broadcast %cst_62 : f32 to vector<4x16xf32>
      %133 = vector.extract_strided_slice %38 {offsets = [0, 0], sizes = [4, 1], strides = [1, 1]} : vector<4x4xf32> to vector<4x1xf32>
      %134 = vector.extract_strided_slice %126 {offsets = [0, 0], sizes = [1, 16], strides = [1, 1]} : vector<4x16xf32> to vector<1x16xf32>
      %135 = vector.broadcast %133 : vector<4x1xf32> to vector<4x16xf32>
      %136 = vector.broadcast %134 : vector<1x16xf32> to vector<4x16xf32>
      %137 = arith.mulf %135, %136 : vector<4x16xf32>
      %138 = arith.addf %131, %137 : vector<4x16xf32>
      %139 = vector.extract_strided_slice %130 {offsets = [0, 0], sizes = [1, 16], strides = [1, 1]} : vector<4x16xf32> to vector<1x16xf32>
      %140 = vector.broadcast %133 : vector<4x1xf32> to vector<4x16xf32>
      %141 = vector.broadcast %139 : vector<1x16xf32> to vector<4x16xf32>
      %142 = arith.mulf %140, %141 : vector<4x16xf32>
      %143 = arith.addf %132, %142 : vector<4x16xf32>
      %144 = vector.extract_strided_slice %38 {offsets = [0, 1], sizes = [4, 1], strides = [1, 1]} : vector<4x4xf32> to vector<4x1xf32>
      %145 = vector.extract_strided_slice %126 {offsets = [1, 0], sizes = [1, 16], strides = [1, 1]} : vector<4x16xf32> to vector<1x16xf32>
      %146 = vector.broadcast %144 : vector<4x1xf32> to vector<4x16xf32>
      %147 = vector.broadcast %145 : vector<1x16xf32> to vector<4x16xf32>
      %148 = arith.mulf %146, %147 : vector<4x16xf32>
      %149 = arith.addf %138, %148 : vector<4x16xf32>
      %150 = vector.extract_strided_slice %130 {offsets = [1, 0], sizes = [1, 16], strides = [1, 1]} : vector<4x16xf32> to vector<1x16xf32>
      %151 = vector.broadcast %144 : vector<4x1xf32> to vector<4x16xf32>
      %152 = vector.broadcast %150 : vector<1x16xf32> to vector<4x16xf32>
      %153 = arith.mulf %151, %152 : vector<4x16xf32>
      %154 = arith.addf %143, %153 : vector<4x16xf32>
      %155 = vector.extract_strided_slice %38 {offsets = [0, 2], sizes = [4, 1], strides = [1, 1]} : vector<4x4xf32> to vector<4x1xf32>
      %156 = vector.extract_strided_slice %126 {offsets = [2, 0], sizes = [1, 16], strides = [1, 1]} : vector<4x16xf32> to vector<1x16xf32>
      %157 = vector.broadcast %155 : vector<4x1xf32> to vector<4x16xf32>
      %158 = vector.broadcast %156 : vector<1x16xf32> to vector<4x16xf32>
      %159 = arith.mulf %157, %158 : vector<4x16xf32>
      %160 = arith.addf %149, %159 : vector<4x16xf32>
      %161 = vector.extract_strided_slice %130 {offsets = [2, 0], sizes = [1, 16], strides = [1, 1]} : vector<4x16xf32> to vector<1x16xf32>
      %162 = vector.broadcast %155 : vector<4x1xf32> to vector<4x16xf32>
      %163 = vector.broadcast %161 : vector<1x16xf32> to vector<4x16xf32>
      %164 = arith.mulf %162, %163 : vector<4x16xf32>
      %165 = arith.addf %154, %164 : vector<4x16xf32>
      %166 = vector.extract_strided_slice %38 {offsets = [0, 3], sizes = [4, 1], strides = [1, 1]} : vector<4x4xf32> to vector<4x1xf32>
      %167 = vector.extract_strided_slice %126 {offsets = [3, 0], sizes = [1, 16], strides = [1, 1]} : vector<4x16xf32> to vector<1x16xf32>
      %168 = vector.broadcast %166 : vector<4x1xf32> to vector<4x16xf32>
      %169 = vector.broadcast %167 : vector<1x16xf32> to vector<4x16xf32>
      %170 = arith.mulf %168, %169 : vector<4x16xf32>
      %171 = arith.addf %160, %170 : vector<4x16xf32>
      %172 = vector.extract_strided_slice %130 {offsets = [3, 0], sizes = [1, 16], strides = [1, 1]} : vector<4x16xf32> to vector<1x16xf32>
      %173 = vector.broadcast %166 : vector<4x1xf32> to vector<4x16xf32>
      %174 = vector.broadcast %172 : vector<1x16xf32> to vector<4x16xf32>
      %175 = arith.mulf %173, %174 : vector<4x16xf32>
      %176 = arith.addf %165, %175 : vector<4x16xf32>
      %177 = vector.broadcast %40 : vector<4x1xf32> to vector<4x16xf32>
      %178 = arith.mulf %171, %177 : vector<4x16xf32>
      %179 = vector.broadcast %41 : vector<4x1xf32> to vector<4x16xf32>
      %180 = arith.addf %178, %179 : vector<4x16xf32>
      %181 = vector.broadcast %42 : vector<4x1xf32> to vector<4x16xf32>
      %182 = arith.mulf %176, %181 : vector<4x16xf32>
      %183 = vector.broadcast %43 : vector<4x1xf32> to vector<4x16xf32>
      %184 = arith.addf %182, %183 : vector<4x16xf32>
      %185 = arith.mulf %180, %184 : vector<4x16xf32>
      %cst_63 = arith.constant dense<0xFF800000> : vector<16xf32>
      %186 = vector.multi_reduction <maximumf>, %185, %cst_63 [0] : vector<4x16xf32> to vector<16xf32>
      %187 = vector.shape_cast %186 : vector<16xf32> to vector<1x16xf32>
      %188 = vector.broadcast %187 : vector<1x16xf32> to vector<4x16xf32>
      %189 = arith.subf %185, %188 : vector<4x16xf32>
      %190 = math.exp %189 : vector<4x16xf32>
      %cst_64 = arith.constant dense<0.000000e+00> : vector<16xf32>
      %191 = vector.multi_reduction <add>, %190, %cst_64 [0] : vector<4x16xf32> to vector<16xf32>
      %192 = vector.shape_cast %191 : vector<16xf32> to vector<1x16xf32>
      %193 = tpu.reciprocal %192 {approx = true} : vector<1x16xf32> -> vector<1x16xf32>
      %194 = vector.broadcast %193 : vector<1x16xf32> to vector<4x16xf32>
      %195 = arith.mulf %190, %194 : vector<4x16xf32>
      %196 = vector.extract_strided_slice %195 {offsets = [0, 0], sizes = [1, 16], strides = [1, 1]} : vector<4x16xf32> to vector<1x16xf32>
      %197 = vector.broadcast %196 : vector<1x16xf32> to vector<4x16xf32>
      %198 = arith.mulf %197, %184 : vector<4x16xf32>
      %199 = vector.extract_strided_slice %195 {offsets = [1, 0], sizes = [1, 16], strides = [1, 1]} : vector<4x16xf32> to vector<1x16xf32>
      %200 = vector.broadcast %199 : vector<1x16xf32> to vector<4x16xf32>
      %201 = arith.mulf %200, %180 : vector<4x16xf32>
      %202 = arith.addf %198, %201 : vector<4x16xf32>
      %c1_65 = arith.constant 1 : index
      %c0_66 = arith.constant 0 : index
      %c0_67 = arith.constant 0 : index
      %203 = vector.load %arg5[%c1_65, %c0_66, %c0_67] : memref<2x4x16xf32, #tpu.memory_space<vmem>>, vector<1x4x16xf32>
      %204 = vector.shape_cast %203 : vector<1x4x16xf32> to vector<4x16xf32>
      %205 = vector.shape_cast %202 : vector<4x16xf32> to vector<1x4x16xf32>
      tpu.vector_store %arg5[%c1_65, %c0_66, %c0_67], %205 {strides = array<i32>} : memref<2x4x16xf32, #tpu.memory_space<vmem>>, vector<1x4x16xf32>,
    } else {
    }
    return
  }
  func.func @transform_0(%arg0: i32, %arg1: i32) -> (i32, i32, i32, i32) {
    %c0_i32 = arith.constant 0 : i32
    %c0_i32_0 = arith.constant 0 : i32
    %c0_i32_1 = arith.constant 0 : i32
    return %arg0, %c0_i32, %arg1, %c0_i32_0 : i32, i32, i32, i32
  }
  func.func @transform_1(%arg0: i32, %arg1: i32) -> (i32, i32) {
    %c0_i32 = arith.constant 0 : i32
    %c0_i32_0 = arith.constant 0 : i32
    %c0_i32_1 = arith.constant 0 : i32
    return %c0_i32, %c0_i32_0 : i32, i32
  }
  func.func @transform_2(%arg0: i32, %arg1: i32) -> (i32, i32) {
    %c0_i32 = arith.constant 0 : i32
    %c0_i32_0 = arith.constant 0 : i32
    %c0_i32_1 = arith.constant 0 : i32
    return %c0_i32, %c0_i32_0 : i32, i32
  }
  func.func @transform_3(%arg0: i32, %arg1: i32) -> (i32, i32, i32) {
    %c0_i32 = arith.constant 0 : i32
    %c0_i32_0 = arith.constant 0 : i32
    %c0_i32_1 = arith.constant 0 : i32
    return %arg0, %c0_i32, %c0_i32_0 : i32, i32, i32
  }
}

</mosaic_0001>

<bundles_post_ra>
// kernel: tpu_custom_call.1
= control target key start
LH: loop header
LB: loop body
LE: loop exit
PB: predicated region body
PF: predicated region fallthrough
CT: control target
= control target key end

     0   :  { %s1422_s0 = inlined_call_operand.hbm [shape: f32[4,4,16,16], index: 0, kind: input, shape index: {}]   ;;  %s1423_s1 = inlined_call_operand.hbm [shape: f32[4,4], index: 1, kind: input, shape index: {}]   ;;  %s1424_s2 = inlined_call_operand.hbm [shape: f32[4,4], index: 2, kind: input, shape index: {}]   ;;  %s1425_s3 = inlined_call_operand.hbm [shape: f32[4,4,16], index: 3, kind: output, shape index: {}]  }
   0x1   :  { %1432 = sst [smem:[#allocation14_spill]] %s1423_s1 }
   0x2   :  { %8 = vsyncpa [#allocation5], 0 }
   0x3   :  { %10 = vsyncpa [#allocation5 + $0x1], 0 }
   0x4   :  { %11 = vsyncpa [#allocation8], 0 }
   0x5   :  { %12 = vsyncpa [#allocation6], 0 }
   0x6   :  { %14 = vsyncpa [#allocation6 + $0x1], 0  ;;  %s1128_s12 = smov 0   ;;  %s1130_s13 = smov 0  }
   0x7   :  { %s1132_s14 = smov 0   ;;  %s1134_s15 = smov 0  }
   0x8   :  { %s1136_s16 = smov 0   ;;  %s1138_s17 = smov 0  }
   0x9 LB: > { %s786_s18 = sadd.s32 4294967295, %s1092_s17   ;;  %s787_s19 = sadd.s32 4294967294, %s1092_s17   ;;  %s1092_s17 = sphi %s1138_s17, %s20_s17   ;;  %s1088_s16 = sphi %s1136_s16, %s1453_s16   ;;  %s1084_s15 = sphi %s1134_s15, %s1452_s15   ;;  %s1080_s14 = sphi %s1132_s14, %s1451_s14   ;;  %s1076_s13 = sphi %s1130_s13, %s1450_s13   ;;  %s1072_s12 = sphi %s1128_s12, %s1449_s12  }
   0xa   : > { %s41_s20 = sadd.s32 1, %s1080_s14  ;;  %p48_p0 = scmp.ne.s32.totalorder %s1080_s14, %s1076_s13 }
   0xb   : > { %p49_p1 = scmp.eq.s32.totalorder %s1092_s17, 0  ;;  %p54_p2 = scmp.ne.s32.totalorder %s1076_s13, %s1072_s12 }
   0xc   : > { %p1166_p3 = scmp.eq.s32.totalorder %s786_s18, 0  ;;  %p120_p4 = scmp.eq.s32.totalorder %s786_s18, 1 }
   0xd   : > { %p1170_p5 = por %p49_p1, %p48_p0  ;;  %p126_p6 = scmp.eq.s32.totalorder %s787_s19, 1 }
   0xe   : > { %s1433_s21 = scalar_select %p1166_p3, 1, 0 }
   0xf   : > { %p1176_p7 = por %p1166_p3, %p54_p2  ;;  %p1180_p8 = por %p120_p4, %p48_p0 }
  0x10   : > { %p1184_p9 = por %p126_p6, %p54_p2  ;;  %p788_p10 = scmp.ge.s32.totalorder %s1092_s17, 1 }
  0x11   : > { %s1435_s23 = scalar_select %p1176_p7, 1, 0 }
  0x12   : > { %s1436_s24 = scalar_select %p1180_p8, 1, 0 }
  0x13   : > { %s1437_s25 = scalar_select %p1184_p9, 1, 0 }
  0x14   : > { %p133_p11 = scmp.lt.s32.totalorder %s1092_s17, 3  ;;  %s1094_s27 = smov [#allocation7]  }
  0x15   : > { %s146_s28 = sshll.u32 %s1094_s27, 4  ;;  %p847_p1 = scmp.lt.s32.totalorder %s1092_s17, 2  ;;  %s147_s28 = int_to_ptr.vmem [resolvable:$true] %s146_s28 }
  0x16   : > { %p1191_p13 = pnand %p788_p10, %p133_p11  ;;  %s1095_s30 = smov [#allocation9]  }
  0x17   : > { %p1200_p4 = pnand %p847_p1, %p1170_p5  ;;  %s157_s4 = sshll.u32 %s1095_s30, 4  ;;  %s158_s4 = int_to_ptr.vmem [resolvable:$true] %s157_s4 }
  0x18   : > { %s1438_s26 = scalar_select %p1191_p13, 1, 0 }
  0x19   : > { %p830_p0 = pneg %p1191_p13  ;;  %s939_s6 = scalar_lea.vmem %s147_s28, 64 }
  0x1a   : > { %s1439_s29 = scalar_select %p1200_p4, 1, 0 }
  0x1b   : > { %p1206_p2 = pnand %p830_p0, %p1166_p3  ;;  %p940_p10 = scmp.ne.s32.totalorder %s147_s28, %s939_s6 }
  0x1c   : > { %p947_p1 = scmp.lt.s32.totalorder %s147_s28, %s147_s28  ;;  %p948_p12 = scmp.lt.s32.totalorder %s939_s6, %s939_s6 }
  0x1d   : > { %p930_p6 = pneg %p1206_p2 }
  0x1e   : > { %p949_p9 = por %p948_p12, %p947_p1 }
  0x1f   : > { %p942_p5 = pnand %p940_p10, %p930_p6 }
  0x21   : > { %p943_p11 = pneg %p942_p5 }
  0x23   : > { %p950_p8 = pnand %p949_p9, %p943_p11 }
  0x25   : > { %953 = shalt.err (!%p950_p8)
}
  0x26   : > { %s1441_s1 = sld [smem:[#allocation14_spill]]  ;;  %s965_s9 = scalar_lea.vmem %s158_s4, 64 }
  0x27   : > { %p966_p0 = scmp.ne.s32.totalorder %s158_s4, %s965_s9  ;;  %p973_p10 = scmp.lt.s32.totalorder %s158_s4, %s158_s4 }
  0x28   : > { %p974_p5 = scmp.lt.s32.totalorder %s965_s9, %s965_s9 }
  0x29   : > { %p968_p3 = pnand %p966_p0, %p930_p6 }
  0x2a   : > { %p975_p13 = por %p974_p5, %p973_p10 }
  0x2b   : > { %p969_p7 = pneg %p968_p3 }
  0x2c   : > { %833 = dma.hbm_to_vmem [thread:$0]  (!%p1206_p2), %s1441_s1, 64, %s147_s28, [#allocation8]  }
  0x2d   : > { %p976_p4 = pnand %p975_p13, %p969_p7 }
  0x2f   : > { %979 = shalt.err (!%p976_p4)
}
  0x30   : > { %836 = dma.hbm_to_vmem [thread:$0]  (!%p1206_p2), %s1424_s2, 64, %s158_s4, [#allocation8]  }
  0x31   : > { %s32_s18 = sadd.s32 1, %s1088_s16  ;;  %s168_s19 = sand.u32 1, %s1080_s14  }
  0x32   : > { %p34_p3 = scmp.ge.s32.totalorder %s32_s18, 2  ;;  %s792_s22 = sshll.u32 %s168_s19, 7 }
  0x33   : > { %s816_s27 = sshll.u32 %s1088_s16, 11  ;;  %s172_s7 = scalar_lea.vmem [#allocation4], %s792_s22 }
  0x34   : > { %s1455_s18 = smov (%p34_p3, %s32_s18), 0  ;;  %s181_s5 = scalar_lea.hbm %s1422_s0, %s816_s27 }
  0x35   : > { %s36_s6 = ssub.s32 %s1088_s16, %s1455_s18  ;;  %s182_s8 = sshll.u32 %s172_s7, 4  ;;  %s183_s8 = int_to_ptr.vmem [resolvable:$true] %s182_s8 }
  0x36   : > { %p39_p7 = scmp.eq.s32.totalorder %s36_s6, 0  ;;  %s169_s4 = scalar_lea.sflag [#allocation5], %s168_s19 }
  0x37   : > { %p1442_p8 = scmp.ne.s32.totalorder %s1439_s29, 0  ;;  %s993_s10 = scalar_lea.vmem %s183_s8, 2048 }
  0x38   : > { %s1241_s9 = scalar_select %p39_p7, %s1080_s14, %s41_s20  }
  0x39   : > { %p982_p9 = pneg %p1442_p8  ;;  %p994_p12 = scmp.ne.s32.totalorder %s183_s8, %s993_s10 }
  0x3a   : > { %s1096_s11 = smov [#allocation4]  }
  0x3b   : > { %p996_p13 = pnand %p994_p12, %p982_p9  ;;  %s998_s1 = sshll.u32 %s1096_s11, 4  ;;  %s999_s1 = int_to_ptr.vmem [resolvable:$false] %s998_s1 }
  0x3c   : > { %s1000_s28 = scalar_lea.vmem %s999_s1, 4096  ;;  %p1001_p2 = scmp.lt.s32.totalorder %s183_s8, %s999_s1 }
  0x3d   : > { %p997_p4 = pneg %p996_p13  ;;  %p1002_p6 = scmp.lt.s32.totalorder %s1000_s28, %s993_s10 }
  0x3f   : > { %p1003_p11 = por %p1002_p6, %p1001_p2 }
  0x41   : > { %p1004_p1 = pnand %p1003_p11, %p997_p4 }
  0x43   : > { %1007 = shalt.err (!%p1004_p1)
}
  0x44   : > { %s1097_s22 = smov 128   ;;  %s1098_s20 = smov 8  }
  0x45   : > { %840 = dma.hbm_to_vmem [thread:$0]  (!%p1442_p8), %s181_s5, 2048, %s183_s8, %s169_s4, %s1097_s22, %s1097_s22, %s1098_s20  }
  0x46   : > { %p1443_p0 = scmp.ne.s32.totalorder %s1438_s26, 0 }
  0x47   : > { %s1250_s19 = sand.u32 (!%p1443_p0), 1, %s1076_s13   ;;  %p1444_p10 = scmp.ne.s32.totalorder (!%p1443_p0), %s1435_s23, 0 }
  0x48   : > { %194 = sbr.rel (%p1443_p0) target bundleno = 313 (0x139), region = 32  ;;  %s797_s27 = sshll.u32 (!%p1443_p0), %s1250_s19, 7 }
  0x49   : > { %s197_s1 = scalar_lea.sflag (!%p1443_p0), [#allocation5], %s1250_s19  ;;  %s1254_s30 = scalar_lea.vmem (!%p1443_p0), [#allocation4], %s797_s27 }
  0x4d   : > { %1059 = dma.done.wait (%p1444_p10), %s197_s1, 2048  }
  0x4e   : > { %1061 = vsyncadd (%p1444_p10), %s197_s1, 4294965248  ;;  %p1445_p5 = scmp.ne.s32.totalorder %s1433_s21, 0 }
  0x50   : > { %1063 = dma.done.wait (%p1445_p5), [#allocation8], 128  }
  0x51   : > { %1065 = vsyncadd (%p1445_p5), [#allocation8], 4294967168  ;;  %v1099_v0 = vmov 2   ;;  %v1100_v1 = vmov 0   ;;  %vm238_vm0 = vcmask 125952   ;;  %v1101_v2 = vmov -inf  }
  0x52   : > { %913 = vset.pattern.permute.xlu1 %v1099_v0  ;;  %911 = vset.pattern.permute.xlu0 %v1100_v1  ;;  %239 = vst.msk [vmem:[#allocation2] sm:$0xf] %vm238_vm0, %v1101_v2  ;;  %240 = vst.msk [vmem:[#allocation2 + $0x4] sm:$0xf] %vm238_vm0, %v1101_v2  ;;  %v1102_v3 = vmov 0.0   ;;  %vm252_vm1 = vcmask 130048  }
  0x53   : > { %241 = vst.msk [vmem:[#allocation3] sm:$0xf] %vm238_vm0, %v1102_v3  ;;  %242 = vst.msk [vmem:[#allocation3 + $0x4] sm:$0xf] %vm238_vm0, %v1102_v3  ;;  %v458_v4 = vld [vmem:[#allocation7] sm:$0xf] }
  0x54   : > { %v243_v5 = vld [vmem:[%s1254_s30] sm:$0xff]  ;;  %497 = vperm.xlu1 %913, %v458_v4   ;;  %465 = vperm.xlu0 %911, %v458_v4   ;;  %v244_v6 = vld [vmem:[%s1254_s30 + $0x8] sm:$0xff]  ;;  %v245_v7 = vld [vmem:[%s1254_s30 + $0x10] sm:$0xff]  ;;  %v1103_v26 = vmov 3   ;;  %v1104_v27 = vmov 1   ;;  %vm293_vm2 = vcmask 1041409  }
  0x55   : > { %v246_v8 = vld [vmem:[%s1254_s30 + $0x18] sm:$0xff]  ;;  %v253_v9 = vsel %vm252_vm1, %v243_v5, -inf  ;;  %v247_v10 = vld [vmem:[%s1254_s30 + $0x20] sm:$0xff]  ;;  %v248_v11 = vld [vmem:[%s1254_s30 + $0x28] sm:$0xff]  ;;  %v254_v12 = vsel %vm252_vm1, %v244_v6, -inf  ;;  %v262_v13 = vsel %vm252_vm1, %v245_v7, -inf }
  0x56   : > { %v263_v14 = vsel %vm252_vm1, %v246_v8, -inf  ;;  %v304_v15 = vsel %vm252_vm1, %v243_v5, 0.0  ;;  %v249_v16 = vld [vmem:[%s1254_s30 + $0x30] sm:$0xff]  ;;  %v250_v17 = vld [vmem:[%s1254_s30 + $0x38] sm:$0xff]  ;;  %v255_v18 = vmax.f32 %v253_v9, %v254_v12  ;;  %v271_v20 = vsel %vm252_vm1, %v247_v10, -inf  ;;  %s800_s21 = sshll.u32 %s1250_s19, 3 }
  0x57   : > { %v264_v19 = vmax.f32 %v262_v13, %v263_v14  ;;  %v272_v21 = vsel %vm252_vm1, %v248_v11, -inf  ;;  %v280_v23 = vsel %vm252_vm1, %v249_v16, -inf  ;;  %v281_v24 = vsel %vm252_vm1, %v250_v17, -inf  ;;  %v1292_v40 = vld [vmem:[#allocation9] sm:$0xf]  ;;  %s817_s23 = sshll.u32 %s1084_s15, 7 }
  0x58   : > { %v273_v22 = vmax.f32 %v271_v20, %v272_v21  ;;  %v305_v25 = vsel %vm252_vm1, %v244_v6, 0.0  ;;  %914 = vset.pattern.permute.xlu1 %v1103_v26  ;;  %912 = vset.pattern.permute.xlu0 %v1104_v27  ;;  %v256_v28 = vrot.slane %v255_v18, 4  ;;  %v282_v30 = vmax.f32 %v280_v23, %v281_v24  ;;  %v801_v13 = vld [vmem:[%s1254_s30 + $0x40] sm:$0xff]  ;;  %v802_v23 = vld [vmem:[%s1254_s30 + $0x48] sm:$0xff]  ;;  %v803_v24 = vld [vmem:[%s1254_s30 + $0x50] sm:$0xff]  ;;  %s230_s26 = scalar_lea.vmem [#allocation10], %s800_s21  ;;  %s1370_s7 = scalar_lea.hbm %s1425_s3, %s817_s23 }
  0x59   : > { %v265_v29 = vrot.slane %v264_v19, 4  ;;  %v306_v31 = vadd.f32 %v305_v25, %v304_v15  ;;  %513 = vperm.xlu1 %914, %v458_v4   ;;  %481 = vperm.xlu0 %912, %v458_v4   ;;  %v313_v33 = vsel %vm252_vm1, %v245_v7, 0.0  ;;  %v314_v34 = vsel %vm252_vm1, %v246_v8, 0.0  ;;  %v251_v14 = vld [vmem:[#allocation2] sm:$0xf]  ;;  %v804_v25 = vld [vmem:[%s1254_s30 + $0x58] sm:$0xff] }
  0x5a   : > { %v274_v32 = vrot.slane %v273_v22, 4  ;;  %v322_v35 = vsel %vm252_vm1, %v247_v10, 0.0  ;;  %v257_v36 = vmax.f32 %v255_v18, %v256_v28  ;;  %v283_v38 = vrot.slane %v282_v30, 4  ;;  %s683_s29 = sshll.u32 %s230_s26, 4  ;;  %s670_s15 = scalar_lea.sflag [#allocation6], %s1250_s19  ;;  %s1372_s29 = int_to_ptr.vmem [resolvable:$true] %s683_s29 }
  0x5b   : > { %v266_v37 = vmax.f32 %v264_v19, %v265_v29  ;;  %v307_v39 = vrot.slane %v306_v31, 4  ;;  %v315_v42 = vadd.f32 %v314_v34, %v313_v33  ;;  %v323_v43 = vsel %vm252_vm1, %v248_v11, 0.0  ;;  %s1008_s8 = scalar_lea.vmem %s1372_s29, 128  ;;  %p1446_p7 = scmp.ne.s32.totalorder %s1436_s24, 0 }
  0x5c   : > { %v275_v41 = vmax.f32 %v273_v22, %v274_v32  ;;  %v331_v44 = vsel %vm252_vm1, %v249_v16, 0.0  ;;  %vm295_vm3 = vcmask 1042434   ;;  %v258_v45 = vrot.slane %v257_v36, 2  ;;  %p1009_p3 = scmp.ne.s32.totalorder %s1372_s29, %s1008_s8  ;;  %s1105_s4 = smov [#allocation10]  }
  0x5d   : > { %v267_v46 = vrot.slane %v266_v37, 2  ;;  %v284_v47 = vmax.f32 %v282_v30, %v283_v38  ;;  %v308_v48 = vadd.f32 %v307_v39, %v306_v31  ;;  %915 = vset.pattern.permute.xlu1 %v1100_v1  ;;  %916 = vset.pattern.permute.xlu0 %v1099_v0  ;;  %vm297_vm4 = vcmask 1043459   ;;  %s1012_s10 = sshll.u32 %s1105_s4, 4  ;;  %s1013_s10 = int_to_ptr.vmem [resolvable:$false] %s1012_s10 }
  0x5e   : > { %v276_v49 = vrot.slane %v275_v41, 2  ;;  %v316_v50 = vrot.slane %v315_v42, 4  ;;  %v324_v51 = vadd.f32 %v323_v43, %v322_v35  ;;  %v332_v52 = vsel %vm252_vm1, %v250_v17, 0.0  ;;  %530 = vperm.xlu1 %915, %v1292_v40   ;;  %540 = vperm.xlu0 %916, %v1292_v40   ;;  %v805_v35 = vld [vmem:[%s1254_s30 + $0x60] sm:$0xff]  ;;  %p1010_p8 = pnand %p1009_p3, %p1446_p7  ;;  %s1014_s11 = scalar_lea.vmem %s1013_s10, 256 }
  0x5f   : > { %v259_v53 = vmax.f32 %v257_v36, %v258_v45  ;;  %v268_v54 = vmax.f32 %v266_v37, %v267_v46  ;;  %v285_v55 = vrot.slane %v284_v47, 2  ;;  %v309_v56 = vrot.slane %v308_v48, 2  ;;  %v806_v36 = vld [vmem:[%s1254_s30 + $0x68] sm:$0xff]  ;;  %v808_v45 = vld [vmem:[%s1254_s30 + $0x78] sm:$0xff]  ;;  %p1015_p12 = scmp.lt.s32.totalorder %s1372_s29, %s1013_s10  ;;  %p1016_p13 = scmp.lt.s32.totalorder %s1014_s11, %s1008_s8 }
  0x60   : > { %v277_v57 = vmax.f32 %v275_v41, %v276_v49  ;;  %v317_v58 = vadd.f32 %v316_v50, %v315_v42  ;;  %v325_v59 = vrot.slane %v324_v51, 4  ;;  %v333_v60 = vadd.f32 %v332_v52, %v331_v44  ;;  %v807_v44 = vld [vmem:[%s1254_s30 + $0x70] sm:$0xff]  ;;  %v303_v50 = vld [vmem:[#allocation3] sm:$0xf]  ;;  %p1011_p9 = pneg %p1010_p8 }
  0x61   : > { %v260_v61 = vrot.slane %v259_v53, 1  ;;  %v269_v62 = vrot.slane %v268_v54, 1  ;;  %v286_v63 = vmax.f32 %v284_v47, %v285_v55  ;;  %v310_v0 = vadd.f32 %v309_v56, %v308_v48  ;;  %p1017_p4 = por %p1016_p13, %p1015_p12 }
  0x62   : > { %v278_v1 = vrot.slane %v277_v57, 1  ;;  %v318_v2 = vrot.slane %v317_v58, 2  ;;  %v326_v3 = vadd.f32 %v325_v59, %v324_v51  ;;  %v334_v4 = vrot.slane %v333_v60, 4  ;;  %917 = vset.pattern.permute.xlu1 %v1104_v27  ;;  %919 = vset.pattern.permute.xlu0 %v1103_v26 }
  0x63   : > { %v261_v5 = vmax.f32 %v259_v53, %v260_v61  ;;  %v270_v6 = vmax.f32 %v268_v54, %v269_v62  ;;  %v287_v7 = vrot.slane %v286_v63, 1  ;;  %v311_v8 = vrot.slane %v310_v0, 1  ;;  %535 = vperm.xlu1 %917, %v1292_v40   ;;  %p1018_p2 = pnand %p1017_p4, %p1011_p9 }
  0x64   : > { %v279_v9 = vmax.f32 %v277_v57, %v278_v1  ;;  %v319_v10 = vadd.f32 %v318_v2, %v317_v58  ;;  %v327_v11 = vrot.slane %v326_v3, 2  ;;  %v335_v12 = vadd.f32 %v334_v4, %v333_v60 }
  0x65   : > { %v288_v15 = vmax.f32 %v286_v63, %v287_v7  ;;  %v294_v16 = vsel %vm293_vm2, %v270_v6, %v261_v5  ;;  %v312_v17 = vadd.f32 %v311_v8, %v310_v0  ;;  %v361_v18 = vsel %vm252_vm1, %v801_v13, -inf }
  0x66   : > { %v296_v19 = vsel %vm295_vm3, %v279_v9, %v294_v16  ;;  %v320_v20 = vrot.slane %v319_v10, 1  ;;  %v328_v21 = vadd.f32 %v327_v11, %v326_v3  ;;  %v336_v22 = vrot.slane %v335_v12, 2 }
  0x67   : > { %v298_v27 = vsel %vm297_vm4, %v288_v15, %v296_v19  ;;  %v362_v28 = vsel %vm252_vm1, %v802_v23, -inf  ;;  %v370_v29 = vsel %vm252_vm1, %v803_v24, -inf  ;;  %v371_v30 = vsel %vm252_vm1, %v804_v25, -inf  ;;  %918 = vset.pattern.permute.xlu1 %v1103_v26 }
  0x68   : > { %v300_v31 = vmax.f32 %v251_v14, %v298_v27  ;;  %v321_v32 = vadd.f32 %v320_v20, %v319_v10  ;;  %v329_v33 = vrot.slane %v328_v21, 1  ;;  %v337_v34 = vadd.f32 %v336_v22, %v335_v12  ;;  %545 = vperm.xlu1 %918, %v1292_v40  }
  0x69   : > { %v363_v37 = vmax.f32 %v361_v18, %v362_v28  ;;  %v372_v38 = vmax.f32 %v370_v29, %v371_v30  ;;  %v379_v39 = vsel %vm252_vm1, %v805_v35, -inf  ;;  %v380_v41 = vsel %vm252_vm1, %v806_v36, -inf }
  0x6a   : > { %302 = vst.msk [vmem:[#allocation2] sm:$0xf] %vm238_vm0, %v300_v31  ;;  %v330_v42 = vadd.f32 %v329_v33, %v328_v21  ;;  %v338_v26 = vrot.slane %v337_v34, 1  ;;  %v344_v43 = vsel %vm293_vm2, %v321_v32, %v312_v17  ;;  %v381_v46 = vmax.f32 %v379_v39, %v380_v41 }
  0x6b   : > { %v364_v47 = vrot.slane %v363_v37, 4  ;;  %v373_v48 = vrot.slane %v372_v38, 4  ;;  %v388_v49 = vsel %vm252_vm1, %v807_v44, -inf  ;;  %v389_v40 = vsel %vm252_vm1, %v808_v45, -inf }
  0x6c   : > { %v339_v51 = vadd.f32 %v338_v26, %v337_v34  ;;  %v345_v52 = vsel %vm295_vm3, %v330_v42, %v344_v43  ;;  %v382_v53 = vrot.slane %v381_v46, 4  ;;  %v390_v54 = vmax.f32 %v388_v49, %v389_v40 }
  0x6d   : > { %v365_v55 = vmax.f32 %v363_v37, %v364_v47  ;;  %v374_v56 = vmax.f32 %v372_v38, %v373_v48  ;;  %v409_v57 = vsel %vm252_vm1, %v801_v13, 0.0  ;;  %v410_v58 = vsel %vm252_vm1, %v802_v23, 0.0 }
  0x6e   : > { %v346_v59 = vsel %vm297_vm4, %v339_v51, %v345_v52  ;;  %v383_v60 = vmax.f32 %v381_v46, %v382_v53  ;;  %v391_v61 = vrot.slane %v390_v54, 4  ;;  %v411_v62 = vadd.f32 %v410_v58, %v409_v57 }
  0x6f   : > { %v348_v63 = vadd.f32 %v346_v59, %v303_v50  ;;  %v366_v0 = vrot.slane %v365_v55, 2  ;;  %v375_v1 = vrot.slane %v374_v56, 2  ;;  %v418_v2 = vsel %vm252_vm1, %v803_v24, 0.0 }
  0x70   : > { %v384_v3 = vrot.slane %v383_v60, 2  ;;  %v392_v4 = vmax.f32 %v390_v54, %v391_v61  ;;  %v412_v5 = vrot.slane %v411_v62, 4  ;;  %v419_v6 = vsel %vm252_vm1, %v804_v25, 0.0 }
  0x71   : > { %349 = vst.msk [vmem:[#allocation3] sm:$0xf] %vm238_vm0, %v348_v63  ;;  %v367_v7 = vmax.f32 %v365_v55, %v366_v0  ;;  %v376_v8 = vmax.f32 %v374_v56, %v375_v1  ;;  %v420_v9 = vadd.f32 %v419_v6, %v418_v2  ;;  %v427_v10 = vsel %vm252_vm1, %v805_v35, 0.0  ;;  %v408_v56 = vld [vmem:[#allocation3 + $0x4] sm:$0xf] }
  0x72   : > { %v385_v11 = vmax.f32 %v383_v60, %v384_v3  ;;  %v393_v12 = vrot.slane %v392_v4, 2  ;;  %v413_v13 = vadd.f32 %v412_v5, %v411_v62  ;;  %v428_v14 = vsel %vm252_vm1, %v806_v36, 0.0  ;;  %v360_v36 = vld [vmem:[#allocation2 + $0x4] sm:$0xf]  ;;  %v460_v5 = vld [vmem:[#allocation2] sm:$0xf] }
  0x73   : > { %v368_v15 = vrot.slane %v367_v7, 1  ;;  %v377_v16 = vrot.slane %v376_v8, 1  ;;  %v421_v17 = vrot.slane %v420_v9, 4  ;;  %v429_v18 = vadd.f32 %v428_v14, %v427_v10 }
  0x74   : > { %v386_v19 = vrot.slane %v385_v11, 1  ;;  %v394_v20 = vmax.f32 %v392_v4, %v393_v12  ;;  %v414_v21 = vrot.slane %v413_v13, 2  ;;  %v436_v22 = vsel %vm252_vm1, %v807_v44, 0.0 }
  0x75   : > { %v369_v23 = vmax.f32 %v367_v7, %v368_v15  ;;  %v378_v24 = vmax.f32 %v376_v8, %v377_v16  ;;  %v422_v25 = vadd.f32 %v421_v17, %v420_v9  ;;  %v430_v27 = vrot.slane %v429_v18, 4 }
  0x76   : > { %v387_v28 = vmax.f32 %v385_v11, %v386_v19  ;;  %v395_v29 = vrot.slane %v394_v20, 1  ;;  %v415_v30 = vadd.f32 %v414_v21, %v413_v13  ;;  %v437_v31 = vsel %vm252_vm1, %v808_v45, 0.0 }
  0x77   : > { %v401_v32 = vsel %vm293_vm2, %v378_v24, %v369_v23  ;;  %v423_v33 = vrot.slane %v422_v25, 2  ;;  %v431_v34 = vadd.f32 %v430_v27, %v429_v18  ;;  %v438_v35 = vadd.f32 %v437_v31, %v436_v22 }
  0x78   : > { %v396_v37 = vmax.f32 %v394_v20, %v395_v29  ;;  %v402_v38 = vsel %vm295_vm3, %v387_v28, %v401_v32  ;;  %v416_v39 = vrot.slane %v415_v30, 1  ;;  %v468_v60 = vlaneseq  ;;  %v461_v62 = vld [vmem:[#allocation3] sm:$0xf] }
  0x79   : > { %v424_v41 = vadd.f32 %v423_v33, %v422_v25  ;;  %v432_v42 = vrot.slane %v431_v34, 2  ;;  %v439_v26 = vrot.slane %v438_v35, 4  ;;  %v462_v1 = vmul.f32 0.0625, %v461_v62 }
  0x7a   : > { %v403_v43 = vsel %vm297_vm4, %v396_v37, %v402_v38  ;;  %v417_v44 = vadd.f32 %v416_v39, %v415_v30  ;;  %v469_v61 = vshrl.u32 %v468_v60, 7 }
  0x7b   : > { %v405_v46 = vmax.f32 %v360_v36, %v403_v43  ;;  %v425_v47 = vrot.slane %v424_v41, 1  ;;  %v433_v48 = vadd.f32 %v432_v42, %v431_v34  ;;  %v440_v45 = vadd.f32 %v439_v26, %v438_v35 }
  0x7c   : > { %v1345_v0 = vsub.s32 0, %v469_v61  ;;  %v1347_v3 = vsub.s32 1, %v469_v61  ;;  %v502_v4 = vsub.s32 2, %v469_v61  ;;  %v518_v19 = vsub.s32 3, %v469_v61 }
  0x7d   : > { %406 = vst.msk [vmem:[#allocation2 + $0x4] sm:$0xf] %vm238_vm0, %v405_v46  ;;  %v426_v49 = vadd.f32 %v425_v47, %v424_v41  ;;  %v434_v40 = vrot.slane %v433_v48, 1  ;;  %v441_v50 = vrot.slane %v440_v45, 2 }
  0x7e   : > { %v471_v9 = vrot.slane %v460_v5, %v1345_v0  ;;  %v477_v10 = vrot.slane %v462_v1, %v1345_v0  ;;  %v487_v13 = vrot.slane %v460_v5, %v1347_v3  ;;  %v493_v14 = vrot.slane %v462_v1, %v1347_v3 }
  0x7f   : > { %v435_v51 = vadd.f32 %v434_v40, %v433_v48  ;;  %v442_v52 = vadd.f32 %v441_v50, %v440_v45  ;;  %v449_v53 = vsel %vm293_vm2, %v426_v49, %v417_v44  ;;  %v503_v17 = vrot.slane %v460_v5, %v502_v4 }
  0x80   : > { %v509_v24 = vrot.slane %v462_v1, %v502_v4  ;;  %v519_v35 = vrot.slane %v460_v5, %v518_v19  ;;  %v525_v43 = vrot.slane %v462_v1, %v518_v19 }
  0x81   : > { %v443_v54 = vrot.slane %v442_v52, 1  ;;  %v450_v55 = vsel %vm295_vm3, %v435_v51, %v449_v53 }
  0x83   : > { %v444_v57 = vadd.f32 %v443_v54, %v442_v52 }
  0x84   : > { %v581_v6 = vld [vmem:[#allocation2 + $0x4] sm:$0xf] }
  0x85   : > { %v451_v58 = vsel %vm297_vm4, %v444_v57, %v450_v55  ;;  %v587_v11 = vrot.slane %v581_v6, %v1345_v0  ;;  %v599_v15 = vrot.slane %v581_v6, %v1347_v3  ;;  %v611_v18 = vrot.slane %v581_v6, %v502_v4 }
  0x86   : > { %v453_v59 = vadd.f32 %v451_v58, %v408_v56  ;;  %v623_v36 = vrot.slane %v581_v6, %v518_v19 }
  0x88   : > { %454 = vst.msk [vmem:[#allocation3 + $0x4] sm:$0xf] %vm238_vm0, %v453_v59 }
  0x8f   : > { %v582_v63 = vld [vmem:[#allocation3 + $0x4] sm:$0xf] }
  0x90   : > { %v583_v2 = vmul.f32 0.0625, %v582_v63 }
  0x92   : > { %v593_v12 = vrot.slane %v583_v2, %v1345_v0  ;;  %v605_v16 = vrot.slane %v583_v2, %v1347_v3  ;;  %v617_v25 = vrot.slane %v583_v2, %v502_v4  ;;  %v629_v44 = vrot.slane %v583_v2, %v518_v19 }
  0xcf   : > { %v498_v7 = vpop.permute.xlu1 %497  ;;  %v466_v8 = vpop.permute.xlu0 %465 }
  0xd0   : > { %v472_v20 = vmul.f32 %v471_v9, %v466_v8  ;;  %v478_v21 = vmul.f32 %v477_v10, %v466_v8  ;;  %v588_v22 = vmul.f32 %v587_v11, %v466_v8  ;;  %v594_v23 = vmul.f32 %v593_v12, %v466_v8 }
  0xd1   : > { %v504_v33 = vmul.f32 %v503_v17, %v498_v7  ;;  %v612_v34 = vmul.f32 %v611_v18, %v498_v7  ;;  %v510_v42 = vmul.f32 %v509_v24, %v498_v7  ;;  %v618_v26 = vmul.f32 %v617_v25, %v498_v7 }
  0xd4   : > { %v514_v27 = vpop.permute.xlu1 %513  ;;  %v482_v28 = vpop.permute.xlu0 %481 }
  0xd5   : > { %v488_v29 = vmul.f32 %v487_v13, %v482_v28  ;;  %v494_v30 = vmul.f32 %v493_v14, %v482_v28  ;;  %v600_v31 = vmul.f32 %v599_v15, %v482_v28  ;;  %v606_v32 = vmul.f32 %v605_v16, %v482_v28 }
  0xd6   : > { %v520_v45 = vmul.f32 %v519_v35, %v514_v27  ;;  %v624_v49 = vmul.f32 %v623_v36, %v514_v27  ;;  %v526_v53 = vmul.f32 %v525_v43, %v514_v27  ;;  %v630_v54 = vmul.f32 %v629_v44, %v514_v27 }
  0xd7   : > { %v489_v37 = vadd.f32 %v488_v29, %v472_v20  ;;  %v601_v38 = vadd.f32 %v600_v31, %v588_v22  ;;  %v495_v39 = vadd.f32 %v494_v30, %v478_v21  ;;  %v607_v41 = vadd.f32 %v606_v32, %v594_v23 }
  0xd9   : > { %v531_v46 = vpop.permute.xlu1 %530  ;;  %v505_v47 = vadd.f32 %v504_v33, %v489_v37  ;;  %v613_v48 = vadd.f32 %v612_v34, %v601_v38  ;;  %v511_v40 = vadd.f32 %v510_v42, %v495_v39  ;;  %v619_v50 = vadd.f32 %v618_v26, %v607_v41  ;;  %v541_v58 = vpop.permute.xlu0 %540 }
  0xdb   : > { %v521_v51 = vadd.f32 %v520_v45, %v505_v47  ;;  %v625_v52 = vadd.f32 %v624_v49, %v613_v48  ;;  %v527_v55 = vadd.f32 %v526_v53, %v511_v40  ;;  %v631_v56 = vadd.f32 %v630_v54, %v619_v50 }
  0xdd   : > { %v533_v59 = vmul.f32 %v531_v46, %v521_v51  ;;  %v632_v60 = vmul.f32 %v625_v52, %v531_v46  ;;  %v543_v61 = vmul.f32 %v541_v58, %v527_v55  ;;  %v634_v62 = vmul.f32 %v631_v56, %v541_v58 }
  0xde   : > { %v536_v57 = vpop.permute.xlu1 %535 }
  0xdf   : > { %v538_v1 = vadd.f32 %v536_v57, %v533_v59  ;;  %v633_v2 = vadd.f32 %v632_v60, %v536_v57 }
  0xe3   : > { %v546_v63 = vpop.permute.xlu1 %545 }
  0xe4   : > { %v548_v4 = vadd.f32 %v546_v63, %v543_v61  ;;  %v635_v5 = vadd.f32 %v634_v62, %v546_v63 }
  0xe6   : > { %v549_v6 = vmul.f32 %v548_v4, %v538_v1  ;;  %v636_v7 = vmul.f32 %v635_v5, %v633_v2 }
  0xe8   : > { %v550_v8 = vsel %vm238_vm0, %v549_v6, -inf  ;;  %v637_v9 = vsel %vm238_vm0, %v636_v7, -inf }
  0xe9   : > { %v551_v10 = vrot.slane %v550_v8, 4  ;;  %v638_v11 = vrot.slane %v637_v9, 4 }
  0xeb   : > { %v552_v12 = vmax.f32 %v550_v8, %v551_v10  ;;  %v639_v13 = vmax.f32 %v637_v9, %v638_v11 }
  0xed   : > { %v553_v14 = vrot.slane %v552_v12, 2  ;;  %v640_v15 = vrot.slane %v639_v13, 2 }
  0xef   : > { %v554_v16 = vmax.f32 %v552_v12, %v553_v14  ;;  %v641_v17 = vmax.f32 %v639_v13, %v640_v15 }
  0xf1   : > { %v555_v18 = vrot.slane %v554_v16, 1  ;;  %v642_v19 = vrot.slane %v641_v17, 1 }
  0xf3   : > { %v556_v20 = vmax.f32 %v554_v16, %v555_v18  ;;  %v643_v21 = vmax.f32 %v641_v17, %v642_v19 }
  0xf5   : > { %v557_v22 = vsub.f32 %v549_v6, %v556_v20  ;;  %v644_v23 = vsub.f32 %v636_v7, %v643_v21 }
  0xf7   : > { %v558_v24 = vmul.f32 1.442695, %v557_v22  ;;  %v645_v25 = vmul.f32 1.442695, %v644_v23 }
  0xf9   : > { %920 = vpow2.f32 %v558_v24 }
  0xfa   : > { %922 = vpow2.f32 %v645_v25 }
 0x106   : > { %v921_v27 = vpop.eup %920 }
 0x107   : > { %v923_v28 = vpop.eup %922  ;;  %v560_v29 = vsel %vm238_vm0, %v921_v27, 0.0 }
 0x108   : > { %v561_v30 = vrot.slane %v560_v29, 4  ;;  %v647_v31 = vsel %vm238_vm0, %v923_v28, 0.0 }
 0x109   : > { %v648_v32 = vrot.slane %v647_v31, 4 }
 0x10a   : > { %v562_v33 = vadd.f32 %v561_v30, %v560_v29 }
 0x10b   : > { %v649_v34 = vadd.f32 %v648_v32, %v647_v31 }
 0x10c   : > { %v563_v35 = vrot.slane %v562_v33, 2 }
 0x10d   : > { %v650_v36 = vrot.slane %v649_v34, 2 }
 0x10e   : > { %v564_v37 = vadd.f32 %v563_v35, %v562_v33 }
 0x10f   : > { %v651_v38 = vadd.f32 %v650_v36, %v649_v34 }
 0x110   : > { %v565_v39 = vrot.slane %v564_v37, 1 }
 0x111   : > { %v652_v41 = vrot.slane %v651_v38, 1 }
 0x112   : > { %v566_v42 = vadd.f32 %v565_v39, %v564_v37 }
 0x113   : > { %v653_v26 = vadd.f32 %v652_v41, %v651_v38 }
 0x114   : > { %924 = vrcp.f32 %v566_v42 }
 0x115   : > { %926 = vrcp.f32 %v653_v26 }
 0x121   : > { %v925_v43 = vpop.eup %924 }
 0x122   : > { %v927_v44 = vpop.eup %926  ;;  %v568_v46 = vmul.f32 %v925_v43, %v921_v27 }
 0x123   : > { %v655_v47 = vmul.f32 %v927_v44, %v923_v28 }
 0x124   : > { %v572_v48 = vrot.slane %v568_v46, %v1345_v0  ;;  %v577_v45 = vrot.slane %v568_v46, %v1347_v3 }
 0x125   : > { %v659_v49 = vrot.slane %v655_v47, %v1345_v0  ;;  %v664_v40 = vrot.slane %v655_v47, %v1347_v3 }
 0x126   : > { %v573_v50 = vmul.f32 %v572_v48, %v548_v4  ;;  %v578_v51 = vmul.f32 %v577_v45, %v538_v1 }
 0x127   : > { %v660_v52 = vmul.f32 %v659_v49, %v635_v5  ;;  %v665_v53 = vmul.f32 %v664_v40, %v633_v2 }
 0x128   : > { %v579_v54 = vadd.f32 %v578_v51, %v573_v50 }
 0x129   : > { %v666_v0 = vadd.f32 %v665_v53, %v660_v52 }
 0x12a   : > { %580 = vst.msk [vmem:[%s230_s26] sm:$0xf] %vm238_vm0, %v579_v54 }
 0x12b   : > { %809 = vst.msk [vmem:[%s230_s26 + $0x4] sm:$0xf] %vm238_vm0, %v666_v0 }
 0x12c   : > { %1021 = shalt.err (!%p1018_p2)
}
 0x12d   : > { %s1022_s28 = scalar_lea.hbm %s1370_s7, 128  ;;  %s1026_s27 = scalar_lea.hbm %s1425_s3, 256 }
 0x12e   : > { %p1023_p6 = scmp.ne.s32.totalorder %s1370_s7, %s1022_s28  ;;  %p1027_p0 = scmp.lt.s32.totalorder %s1370_s7, %s1425_s3 }
 0x12f   : > { %p1028_p10 = scmp.lt.s32.totalorder %s1026_s27, %s1022_s28 }
 0x130   : > { %p1024_p11 = pnand %p1023_p6, %p1446_p7 }
 0x131   : > { %p1029_p5 = por %p1028_p10, %p1027_p0 }
 0x132   : > { %p1025_p1 = pneg %p1024_p11 }
 0x134   : > { %p1030_p3 = pnand %p1029_p5, %p1025_p1 }
 0x136   : > { %1033 = shalt.err (!%p1030_p3)
}
 0x137   : > { %s1106_s21 = smov 64   ;;  %s1107_s23 = smov 4  }
 0x138   : > { %828 = dma.vmem_to_hbm [thread:$0]  (%p1446_p7), %s1372_s29, 128, %s1370_s7, %s670_s15, %s1106_s21, %s1106_s21, %s1107_s23  }
 0x139 PF: > { %s698_s26 = sand.u32 1, %s1072_s12   ;;  %p1447_p8 = scmp.ne.s32.totalorder %s1437_s25, 0 }
 0x13a   : > { %p1448_p9 = scmp.ge.s32.totalorder %s1092_s17, 2  ;;  %s699_s5 = scalar_lea.sflag [#allocation6], %s698_s26 }
 0x13c   : > { %p842_p12 = pnand %p1448_p9, %p1447_p8 }
 0x13e   : > { %p843_p13 = pneg %p842_p12 }
 0x140   : > { %1067 = dma.done.wait (%p843_p13), %s699_s5, 128  }
 0x141   : > { %1069 = vsyncadd (%p843_p13), %s699_s5, 4294967168  ;;  %s20_s17 = sadd.s32 1, %s1092_s17   ;;  %s1449_s12 = smov %s1076_s13 }
 0x142   : > { %p17_p4 = scmp.ge.s32.totalorder %s20_s17, 4   ;;  %s1450_s13 = smov %s1080_s14 }
 0x143   : > { %s1451_s14 = smov %s1241_s9  ;;  %s1452_s15 = smov %s1088_s16 }
 0x144   : > { %s1453_s16 = smov %s1455_s18  ;;  %19 = sbr.rel (!%p17_p4) target bundleno = 9 (0x9), region = 97 }
 0x149   :  { %704 = vsyncpa [#allocation5], 1 }
 0x14a   :  { %706 = vsyncpa [#allocation5 + $0x1], 1 }
 0x14b   :  { %707 = vsyncpa [#allocation8], 1 }
 0x14c   :  { %708 = vsyncpa [#allocation6], 1 }
 0x14d   :  { %710 = vsyncpa [#allocation6 + $0x1], 1 }

</bundles_post_ra>
